<compile_context>
chip_gen: v5e
topology: v5e:2x2
jax: 0.10.0
libtpu: 0.0.40
codegen_flags: <defaults>
</compile_context>

<pallas_src>
import math

import numpy as np
import jax
import jax.numpy as jnp
from jax.experimental import pallas as pl
from jax.experimental.pallas import tpu as pltpu  # noqa: F401  (kept for TPU-backend clarity)

# ----------------------------- problem sizes --------------------------------
N, C, H, W = 2, 4, 16, 16          # batch, in_channels, spatial
HW = H * W                          # 256 (lane-dense axis)
CP = 4                              # psp_channel
POOL_SIZES = (1, 2, 3, 6)           # avg_pool_sizes (len == 4)
NUM_LEVELS = len(POOL_SIZES)
LCP = NUM_LEVELS * CP               # 16 pyramid channels per batch element
OUT_C = C + LCP                     # 20
S2_TOTAL = sum(s * s for s in POOL_SIZES)   # 50 stacked pooled positions
S2_PAD = 128                        # pad stacked pooled axis to one full lane group
BN_EPS = 1e-5


# --------------------- linear operators built on the host -------------------
def adaptive_pool_matrix(out_size, in_size):
    """P[a, i] s.t. pooled[a] = sum_i P[a, i] * x[i]  (PyTorch AdaptiveAvgPool bins)."""
    m = np.zeros((out_size, in_size), np.float32)
    for a in range(out_size):
        start = (a * in_size) // out_size
        end = -((-(a + 1) * in_size) // out_size)  # ceil
        m[a, start:end] = 1.0 / (end - start)
    return m


def bilinear_matrix(in_size, out_size):
    """U[i, a] s.t. up[i] = sum_a U[i, a] * y[a]  (bilinear, align_corners=True)."""
    m = np.zeros((out_size, in_size), np.float32)
    if in_size == 1:
        m[:, 0] = 1.0
        return m
    scale = (in_size - 1) / (out_size - 1)
    for i in range(out_size):
        src = i * scale
        i0 = min(int(math.floor(src)), in_size - 1)
        i1 = min(i0 + 1, in_size - 1)
        frac = src - i0
        m[i, i0] += 1.0 - frac
        m[i, i1] += frac
    return m


def build_fused_operators(level_params):
    """Fold all four pyramid levels (and the batch) into one set of operators."""
    kpool = np.zeros((HW, S2_PAD), np.float32)      # stacked adaptive-pool (lane padded)
    kup = np.zeros((S2_PAD, HW), np.float32)        # stacked bilinear upsample
    w_all = np.zeros((LCP, C), np.float32)          # BN-scale-folded 1x1 conv weights
    mask = np.zeros((LCP, S2_PAD), np.float32)      # 1 on each level's own pooled columns
    shift = np.zeros((LCP, S2_PAD), np.float32)     # folded BN shift, masked to own columns

    off = 0
    for l, s in enumerate(POOL_SIZES):
        pr = adaptive_pool_matrix(s, H)             # (s, H)
        pc = adaptive_pool_matrix(s, W)             # (s, W)
        ur = bilinear_matrix(s, H)                  # (H, s)
        uc = bilinear_matrix(s, W)                  # (W, s)
        kpool[:, off:off + s * s] = np.kron(pr, pc).T        # (HW, s*s)
        kup[off:off + s * s, :] = np.kron(ur, uc).T          # (s*s, HW)

        sc = np.asarray(level_params[l]["scale"], np.float32)
        sh = np.asarray(level_params[l]["shift"], np.float32)
        w = np.asarray(level_params[l]["w"], np.float32)
        w_all[l * CP:(l + 1) * CP, :] = sc[:, None] * w      # fold BN scale into weight
        mask[l * CP:(l + 1) * CP, off:off + s * s] = 1.0
        shift[l * CP:(l + 1) * CP, off:off + s * s] = sh[:, None]
        off += s * s

    # batch-block-diagonal conv weight and batch-tiled mask/shift
    w_big = np.zeros((N * LCP, N * C), np.float32)
    for b in range(N):
        w_big[b * LCP:(b + 1) * LCP, b * C:(b + 1) * C] = w_all
    mask_b = np.tile(mask, (N, 1))
    shift_b = np.tile(shift, (N, 1))

    return (jnp.asarray(kpool), jnp.asarray(w_big), jnp.asarray(mask_b),
            jnp.asarray(shift_b), jnp.asarray(kup))


# --------------------------------- kernel -----------------------------------
def pyramid_pooling_kernel(x_ref, kpool_ref, w_ref, m_ref, sh_ref, kup_ref, o_ref):
    """Whole batch, all pyramid levels, one invocation.

    x_ref     (N*C, HW)        input planes, batch folded into sublanes
    kpool_ref (HW, S2_PAD)     stacked adaptive-avg-pool operators
    w_ref     (N*LCP, N*C)     batch-block-diagonal 1x1 conv (BN scale folded)
    m_ref     (N*LCP, S2_PAD)  block-diagonal level mask
    sh_ref    (N*LCP, S2_PAD)  folded BN shift (zero off-block)
    kup_ref   (S2_PAD, HW)     stacked bilinear upsample operators
    o_ref     (N, OUT_C, HW)
    """
    x = x_ref[...]                                                    # (8, 256)

    # all levels' adaptive average pools in one matmul
    pooled = jnp.dot(x, kpool_ref[...], preferred_element_type=jnp.float32)   # (8, 128)

    # all levels' 1x1 convs (BN scale folded), all batches, in one matmul
    y = jnp.dot(w_ref[...], pooled, preferred_element_type=jnp.float32)       # (32, 128)

    # masked folded-BN shift + ReLU; off-level/padded columns become exactly 0
    z = jnp.maximum(y * m_ref[...] + sh_ref[...], 0.0)                        # (32, 128)

    # all levels' bilinear upsamples in one matmul
    feat = jnp.dot(z, kup_ref[...], preferred_element_type=jnp.float32)       # (32, 256)

    # per-batch slab stores: input passthrough + 16 contiguous pyramid rows
    for b in range(N):
        o_ref[b, :C, :] = x[b * C:(b + 1) * C, :]
        o_ref[b, C:, :] = feat[b * LCP:(b + 1) * LCP, :]


# -------------------------------- wrapper ------------------------------------
def pyramid_pooling(x, fused_ops):
    kpool, w_big, mask, shift, kup = fused_ops
    x_flat = x.reshape(N * C, HW)     # lane-dense layout (layout plumbing only)

    out_flat = pl.pallas_call(
        pyramid_pooling_kernel,
        out_shape=jax.ShapeDtypeStruct((N, OUT_C, HW), jnp.float32),
    )(x_flat, kpool, w_big, mask, shift, kup)
    return out_flat.reshape(N, OUT_C, H, W)


# --------------------------- pure-JAX reference ------------------------------
def _interp_axis(arr, axis, out_len):
    in_len = arr.shape[axis]
    if in_len == 1:
        return jnp.repeat(arr, out_len, axis=axis)
    idx = jnp.arange(out_len)
    src = idx * (in_len - 1) / (out_len - 1)
    i0 = jnp.floor(src).astype(jnp.int32)
    i1 = jnp.minimum(i0 + 1, in_len - 1)
    frac = (src - i0).astype(arr.dtype)
    a0 = jnp.take(arr, i0, axis=axis)
    a1 = jnp.take(arr, i1, axis=axis)
    shape = [1] * arr.ndim
    shape[axis] = out_len
    frac = frac.reshape(shape)
    return a0 * (1.0 - frac) + a1 * frac


def reference_forward(x, level_params):
    feats = [x]
    for l, s in enumerate(POOL_SIZES):
        lp = level_params[l]
        rows = []
        for a in range(s):
            r0, r1 = (a * H) // s, -((-(a + 1) * H) // s)
            cols = []
            for b in range(s):
                c0, c1 = (b * W) // s, -((-(b + 1) * W) // s)
                cols.append(jnp.mean(x[:, :, r0:r1, c0:c1], axis=(2, 3)))
            rows.append(jnp.stack(cols, axis=-1))
        pooled = jnp.stack(rows, axis=-2)                       # (N, C, s, s)
        y = jnp.einsum("pc,ncab->npab", lp["w"], pooled)
        y = jnp.maximum(y * lp["scale"][None, :, None, None]
                        + lp["shift"][None, :, None, None], 0.0)
        feats.append(_interp_axis(_interp_axis(y, 2, H), 3, W))
    return jnp.concatenate(feats, axis=1)


# ---------------------------------- main -------------------------------------
if __name__ == "__main__":
    key = jax.random.PRNGKey(0)
    kx, *lkeys = jax.random.split(key, 1 + NUM_LEVELS)
    x = jax.random.normal(kx, (N, C, H, W), jnp.float32)

    level_params = []
    for l, s in enumerate(POOL_SIZES):
        kw, kg, kb, km, kv = jax.random.split(lkeys[l], 5)
        # 1x1 conv weight (Cp, C) — deterministic xavier-ish init
        w = jax.random.normal(kw, (CP, C), jnp.float32) * (2.0 / C) ** 0.5
        # BatchNorm (eval mode) parameters, folded into a per-channel affine
        gamma = 1.0 + 0.1 * jax.random.normal(kg, (CP,), jnp.float32)
        beta = 0.1 * jax.random.normal(kb, (CP,), jnp.float32)
        rmean = 0.1 * jax.random.normal(km, (CP,), jnp.float32)
        rvar = 1.0 + 0.1 * jax.random.uniform(kv, (CP,), jnp.float32)
        scale = gamma / jnp.sqrt(rvar + BN_EPS)
        shift = beta - rmean * scale
        # TODO(synk): training-mode BatchNorm (batch statistics) is not computed
        # in-kernel; eval-mode folded affine is used instead.
        level_params.append(dict(w=w, scale=scale, shift=shift))

    fused_ops = build_fused_operators(level_params)

    out = pyramid_pooling(x, fused_ops)
    out = jax.block_until_ready(out)

    ref = reference_forward(x, level_params)
    assert out.shape == (N, OUT_C, H, W)
    np.testing.assert_allclose(np.asarray(out), np.asarray(ref),
                               rtol=5e-2, atol=1e-2)
    print("KERNEL_OK")
</pallas_src>

<mosaic_0001>
module attributes {stable_mosaic.version = 11 : i64} {
  func.func @pyramid_pooling_kernel(%arg0: memref<8x256xf32, #tpu.memory_space<vmem>>, %arg1: memref<256x128xf32, #tpu.memory_space<vmem>>, %arg2: memref<32x8xf32, #tpu.memory_space<vmem>>, %arg3: memref<32x128xf32, #tpu.memory_space<vmem>>, %arg4: memref<32x128xf32, #tpu.memory_space<vmem>>, %arg5: memref<128x256xf32, #tpu.memory_space<vmem>>, %arg6: memref<2x20x256xf32, #tpu.memory_space<vmem>>) attributes {dimension_semantics = [], scalar_prefetch = 0 : i64, scratch_operands = 0 : i64, tpu.core_type = #tpu.core_type<tc>} {
    %c0 = arith.constant 0 : index
    %c0_0 = arith.constant 0 : index
    %0 = vector.load %arg0[%c0, %c0_0] : memref<8x256xf32, #tpu.memory_space<vmem>>, vector<8x256xf32>
    %c0_1 = arith.constant 0 : index
    %c0_2 = arith.constant 0 : index
    %1 = vector.load %arg1[%c0_1, %c0_2] : memref<256x128xf32, #tpu.memory_space<vmem>>, vector<256x128xf32>
    %cst = arith.constant dense<0.000000e+00> : vector<8x128xf32>
    %2 = tpu.matmul %0, %1, %cst {dimension_numbers = #tpu.dot_dimension_numbers<[1], [0], [0], [1], [0, 0, 1, 1], [], []>} : vector<8x256xf32>, vector<256x128xf32>, vector<8x128xf32> -> vector<8x128xf32>
    %c0_3 = arith.constant 0 : index
    %c0_4 = arith.constant 0 : index
    %3 = vector.load %arg2[%c0_3, %c0_4] : memref<32x8xf32, #tpu.memory_space<vmem>>, vector<32x8xf32>
    %cst_5 = arith.constant dense<0.000000e+00> : vector<32x128xf32>
    %4 = tpu.matmul %3, %2, %cst_5 {dimension_numbers = #tpu.dot_dimension_numbers<[1], [0], [0], [1], [0, 0, 1, 1], [], []>} : vector<32x8xf32>, vector<8x128xf32>, vector<32x128xf32> -> vector<32x128xf32>
    %c0_6 = arith.constant 0 : index
    %c0_7 = arith.constant 0 : index
    %5 = vector.load %arg3[%c0_6, %c0_7] : memref<32x128xf32, #tpu.memory_space<vmem>>, vector<32x128xf32>
    %6 = arith.mulf %4, %5 : vector<32x128xf32>
    %c0_8 = arith.constant 0 : index
    %c0_9 = arith.constant 0 : index
    %7 = vector.load %arg4[%c0_8, %c0_9] : memref<32x128xf32, #tpu.memory_space<vmem>>, vector<32x128xf32>
    %8 = arith.addf %6, %7 : vector<32x128xf32>
    %cst_10 = arith.constant 0.000000e+00 : f32
    %9 = vector.broadcast %cst_10 : f32 to vector<32x128xf32>
    %10 = arith.maximumf %8, %9 : vector<32x128xf32>
    %c0_11 = arith.constant 0 : index
    %c0_12 = arith.constant 0 : index
    %11 = vector.load %arg5[%c0_11, %c0_12] : memref<128x256xf32, #tpu.memory_space<vmem>>, vector<128x256xf32>
    %cst_13 = arith.constant dense<0.000000e+00> : vector<32x256xf32>
    %12 = tpu.matmul %10, %11, %cst_13 {dimension_numbers = #tpu.dot_dimension_numbers<[1], [0], [0], [1], [0, 0, 1, 1], [], []>} : vector<32x128xf32>, vector<128x256xf32>, vector<32x256xf32> -> vector<32x256xf32>
    %13 = vector.extract_strided_slice %0 {offsets = [0, 0], sizes = [4, 256], strides = [1, 1]} : vector<8x256xf32> to vector<4x256xf32>
    %c0_14 = arith.constant 0 : index
    %c0_15 = arith.constant 0 : index
    %c0_16 = arith.constant 0 : index
    %14 = vector.load %arg6[%c0_14, %c0_15, %c0_16] : memref<2x20x256xf32, #tpu.memory_space<vmem>>, vector<1x4x256xf32>
    %15 = vector.shape_cast %14 : vector<1x4x256xf32> to vector<4x256xf32>
    %16 = vector.shape_cast %13 : vector<4x256xf32> to vector<1x4x256xf32>
    tpu.vector_store %arg6[%c0_14, %c0_15, %c0_16], %16 {strides = array<i32>} : memref<2x20x256xf32, #tpu.memory_space<vmem>>, vector<1x4x256xf32>,
    %17 = vector.extract_strided_slice %12 {offsets = [0, 0], sizes = [16, 256], strides = [1, 1]} : vector<32x256xf32> to vector<16x256xf32>
    %c0_17 = arith.constant 0 : index
    %c4 = arith.constant 4 : index
    %c0_18 = arith.constant 0 : index
    %18 = vector.load %arg6[%c0_17, %c4, %c0_18] : memref<2x20x256xf32, #tpu.memory_space<vmem>>, vector<1x16x256xf32>
    %19 = vector.shape_cast %18 : vector<1x16x256xf32> to vector<16x256xf32>
    %20 = vector.shape_cast %17 : vector<16x256xf32> to vector<1x16x256xf32>
    tpu.vector_store %arg6[%c0_17, %c4, %c0_18], %20 {strides = array<i32>} : memref<2x20x256xf32, #tpu.memory_space<vmem>>, vector<1x16x256xf32>,
    %21 = vector.extract_strided_slice %0 {offsets = [4, 0], sizes = [4, 256], strides = [1, 1]} : vector<8x256xf32> to vector<4x256xf32>
    %c1 = arith.constant 1 : index
    %c0_19 = arith.constant 0 : index
    %c0_20 = arith.constant 0 : index
    %22 = vector.load %arg6[%c1, %c0_19, %c0_20] : memref<2x20x256xf32, #tpu.memory_space<vmem>>, vector<1x4x256xf32>
    %23 = vector.shape_cast %22 : vector<1x4x256xf32> to vector<4x256xf32>
    %24 = vector.shape_cast %21 : vector<4x256xf32> to vector<1x4x256xf32>
    tpu.vector_store %arg6[%c1, %c0_19, %c0_20], %24 {strides = array<i32>} : memref<2x20x256xf32, #tpu.memory_space<vmem>>, vector<1x4x256xf32>,
    %25 = vector.extract_strided_slice %12 {offsets = [16, 0], sizes = [16, 256], strides = [1, 1]} : vector<32x256xf32> to vector<16x256xf32>
    %c1_21 = arith.constant 1 : index
    %c4_22 = arith.constant 4 : index
    %c0_23 = arith.constant 0 : index
    %26 = vector.load %arg6[%c1_21, %c4_22, %c0_23] : memref<2x20x256xf32, #tpu.memory_space<vmem>>, vector<1x16x256xf32>
    %27 = vector.shape_cast %26 : vector<1x16x256xf32> to vector<16x256xf32>
    %28 = vector.shape_cast %25 : vector<16x256xf32> to vector<1x16x256xf32>
    tpu.vector_store %arg6[%c1_21, %c4_22, %c0_23], %28 {strides = array<i32>} : memref<2x20x256xf32, #tpu.memory_space<vmem>>, vector<1x16x256xf32>,
    return
  }
}

</mosaic_0001>

<bundles_post_ra>
// kernel: tpu_custom_call.1
= control target key start
LH: loop header
LB: loop body
LE: loop exit
PB: predicated region body
PF: predicated region fallthrough
CT: control target
= control target key end

     0   :  { %11 = vsyncpa [#allocation3], 0  ;;  %s634_s0 = inlined_call_operand.hbm [shape: f32[8,256], index: 0, kind: input, shape index: {}]   ;;  %s635_s1 = inlined_call_operand.hbm [shape: f32[256,128], index: 1, kind: input, shape index: {}]   ;;  %s636_s2 = inlined_call_operand.vmem [shape: f32[32,8], index: 2, kind: input, shape index: {}]   ;;  %s637_s3 = inlined_call_operand.vmem [shape: f32[32,128], index: 3, kind: input, shape index: {}]   ;;  %s638_s4 = inlined_call_operand.hbm [shape: f32[32,128], index: 4, kind: input, shape index: {}]   ;;  %s639_s5 = inlined_call_operand.hbm [shape: f32[128,256], index: 5, kind: input, shape index: {}]   ;;  %s640_s6 = inlined_call_operand.vmem [shape: f32[2,20,256], index: 6, kind: output, shape index: {}]  }
   0x1   :  { %12 = vsyncpa [#allocation5], 0  ;;  %s29_s23 = sshll.u32 %s635_s1, 4  ;;  %s30_s23 = int_to_ptr.hbm [resolvable:$true] %s29_s23 }
   0x2   :  { %13 = vsyncpa [#allocation8], 0  ;;  %s499_s24 = smov [#allocation4]   ;;  %s19_s28 = sshll.u32 %s634_s0, 4  ;;  %s20_s28 = int_to_ptr.hbm [resolvable:$true] %s19_s28 }
   0x3   :  { %s31_s25 = sshll.u32 %s499_s24, 4  ;;  %s500_s29 = smov 128   ;;  %s32_s25 = int_to_ptr.vmem [resolvable:$true] %s31_s25 }
   0x4   :  { %s501_s30 = smov 8   ;;  %s502_s7 = smov [#allocation2]  }
   0x5   :  { %37 = dma.hbm_to_vmem [thread:$0]  %s30_s23, 4096, %s32_s25, [#allocation5], %s500_s29, %s500_s29, %s501_s30  }
   0x6   :  { %s21_s8 = sshll.u32 %s502_s7, 4  ;;  %s46_s11 = sshll.u32 %s638_s4, 4  ;;  %s22_s8 = int_to_ptr.vmem [resolvable:$true] %s21_s8  ;;  %s47_s11 = int_to_ptr.hbm [resolvable:$true] %s46_s11 }
   0x7   :  { %24 = dma.hbm_to_vmem [thread:$0]  %s20_s28, 256, %s22_s8, [#allocation3]  }
   0x8   :  { %s59_s13 = sshll.u32 %s639_s5, 4  ;;  %s503_s14 = smov [#allocation6]   ;;  %s60_s13 = int_to_ptr.hbm [resolvable:$true] %s59_s13 }
   0x9   :  { %s48_s15 = sshll.u32 %s503_s14, 4  ;;  %s504_s0 = smov [#allocation7]   ;;  %s49_s15 = int_to_ptr.vmem [resolvable:$true] %s48_s15 }
   0xa   :  { %54 = dma.hbm_to_vmem [thread:$0]  %s47_s11, 512, %s49_s15, [#allocation5], %s500_s29, %s500_s29, %s501_s30  }
   0xb   :  { %s61_s16 = sshll.u32 %s504_s0, 4  ;;  %s505_s17 = smov 256   ;;  %s62_s16 = int_to_ptr.vmem [resolvable:$true] %s61_s16 }
   0xc   :  { %s506_s18 = smov 16  }
   0xd   :  { %67 = dma.hbm_to_vmem [thread:$0]  %s60_s13, 4096, %s62_s16, [#allocation8], %s505_s17, %s505_s17, %s506_s18  }
   0xe   :  { %493 = dma.done.wait [#allocation3], 256  }
   0xf   :  { %494 = vsyncadd [#allocation3], 4294967040 }
  0x10   :  { %495 = dma.done.wait [#allocation5], 4608  }
  0x11   :  { %496 = vsyncadd [#allocation5], 4294962688 }
  0x12   :  { %497 = dma.done.wait [#allocation8], 4096  }
  0x13   :  { %498 = vsyncadd [#allocation8], 4294963200  ;;  %v101_v0 = vld [vmem:[#allocation4 + $0x78] sm:$0xff]  ;;  %v100_v2 = vld [vmem:[#allocation4 + $0x70] sm:$0xff]  ;;  %vm162_vm0 = vcmask 64512   ;;  %vm320_vm1 = vcmask 1043456  }
  0x14   :  { %v117_v1 = vld [vmem:[#allocation4 + $0xf8] sm:$0xff]  ;;  %118 = vmatpush.msra.mxu0 %v101_v0  ;;  %v116_v3 = vld [vmem:[#allocation4 + $0xf0] sm:$0xff]  ;;  %v99_v4 = vld [vmem:[#allocation4 + $0x68] sm:$0xff] }
  0x15   :  { %138 = vmatpush.msra.mxu1 %v117_v1  ;;  %v115_v5 = vld [vmem:[#allocation4 + $0xe8] sm:$0xff]  ;;  %v98_v6 = vld [vmem:[#allocation4 + $0x60] sm:$0xff]  ;;  %v97_v8 = vld [vmem:[#allocation4 + $0x58] sm:$0xff] }
  0x16   :  { %119 = vmatpush.msra.mxu0 %v100_v2  ;;  %v114_v7 = vld [vmem:[#allocation4 + $0xe0] sm:$0xff]  ;;  %v113_v9 = vld [vmem:[#allocation4 + $0xd8] sm:$0xff]  ;;  %v96_v10 = vld [vmem:[#allocation4 + $0x50] sm:$0xff] }
  0x17   :  { %139 = vmatpush.msra.mxu1 %v116_v3  ;;  %v112_v11 = vld [vmem:[#allocation4 + $0xd0] sm:$0xff]  ;;  %v95_v12 = vld [vmem:[#allocation4 + $0x48] sm:$0xff]  ;;  %v85_v16 = vld [vmem:[#allocation2 + $0x8] sm:$0xff] }
  0x18   :  { %120 = vmatpush.msra.mxu0 %v99_v4  ;;  %v111_v13 = vld [vmem:[#allocation4 + $0xc8] sm:$0xff]  ;;  %v84_v14 = vld [vmem:[#allocation2] sm:$0xff]  ;;  %v94_v17 = vld [vmem:[#allocation4 + $0x40] sm:$0xff]  ;;  %315 = vst [vmem:[%s640_s6 + $0x8] sm:$0xf] %v85_v16  ;;  %v342_v19 = vrot.slane %v85_v16, 4 }
  0x19   :  { %140 = vmatpush.msra.mxu1 %v115_v5  ;;  %314 = vst [vmem:[%s640_s6] sm:$0xf] %v84_v14  ;;  %v341_v15 = vrot.slane %v84_v14, 4  ;;  %v110_v18 = vld [vmem:[#allocation4 + $0xc0] sm:$0xff]  ;;  %v93_v20 = vld [vmem:[#allocation4 + $0x38] sm:$0xff]  ;;  %v92_v22 = vld [vmem:[#allocation4 + $0x30] sm:$0xff] }
  0x1a   :  { %121 = vmatpush.msra.mxu0 %v98_v6  ;;  %v109_v21 = vld [vmem:[#allocation4 + $0xb8] sm:$0xff]  ;;  %382 = vst [vmem:[%s640_s6 + $0x38] sm:$0xf] %v342_v19  ;;  %v108_v23 = vld [vmem:[#allocation4 + $0xb0] sm:$0xff]  ;;  %v91_v24 = vld [vmem:[#allocation4 + $0x28] sm:$0xff] }
  0x1b   :  { %141 = vmatpush.msra.mxu1 %v114_v7  ;;  %381 = vst [vmem:[%s640_s6 + $0x30] sm:$0xf] %v341_v15  ;;  %v107_v25 = vld [vmem:[#allocation4 + $0xa8] sm:$0xff]  ;;  %v90_v26 = vld [vmem:[#allocation4 + $0x20] sm:$0xff]  ;;  %v89_v28 = vld [vmem:[#allocation4 + $0x18] sm:$0xff] }
  0x1c   :  { %122 = vmatpush.msra.mxu0 %v97_v8  ;;  %v106_v27 = vld [vmem:[#allocation4 + $0xa0] sm:$0xff]  ;;  %v105_v29 = vld [vmem:[#allocation4 + $0x98] sm:$0xff]  ;;  %v88_v30 = vld [vmem:[#allocation4 + $0x10] sm:$0xff] }
  0x1d   :  { %142 = vmatpush.msra.mxu1 %v113_v9  ;;  %v104_v31 = vld [vmem:[#allocation4 + $0x90] sm:$0xff]  ;;  %v87_v32 = vld [vmem:[#allocation4 + $0x8] sm:$0xff]  ;;  %v86_v34 = vld [vmem:[#allocation4] sm:$0xff] }
  0x1e   :  { %123 = vmatpush.msra.mxu0 %v96_v10  ;;  %v103_v33 = vld [vmem:[#allocation4 + $0x88] sm:$0xff]  ;;  %v102_v35 = vld [vmem:[#allocation4 + $0x80] sm:$0xff]  ;;  %v254_v36 = vld [vmem:[#allocation7 + $0xf0] sm:$0xff] }
  0x1f   :  { %143 = vmatpush.msra.mxu1 %v112_v11  ;;  %256 = vmatpush.msra.mxu3 %v254_v36  ;;  %v252_v37 = vld [vmem:[#allocation7 + $0xe0] sm:$0xff]  ;;  %v250_v38 = vld [vmem:[#allocation7 + $0xd0] sm:$0xff]  ;;  %v255_v44 = vld [vmem:[#allocation7 + $0xf8] sm:$0xff] }
  0x20   :  { %124 = vmatpush.msra.mxu0 %v95_v12  ;;  %v248_v41 = vld [vmem:[#allocation7 + $0xc0] sm:$0xff]  ;;  %v158_v43 = vld [vmem:[%s636_s2] sm:$0xff]  ;;  %v253_v46 = vld [vmem:[#allocation7 + $0xe8] sm:$0xff] }
  0x21   :  { %144 = vmatpush.msra.mxu1 %v111_v13  ;;  %257 = vmatpush.msra.mxu3 %v252_v37  ;;  %v246_v45 = vld [vmem:[#allocation7 + $0xb0] sm:$0xff]  ;;  %v244_v47 = vld [vmem:[#allocation7 + $0xa0] sm:$0xff]  ;;  %v251_v48 = vld [vmem:[#allocation7 + $0xd8] sm:$0xff] }
  0x22   :  { %125 = vmatpush.msra.mxu0 %v94_v17  ;;  %v242_v49 = vld [vmem:[#allocation7 + $0x90] sm:$0xff]  ;;  %v249_v50 = vld [vmem:[#allocation7 + $0xc8] sm:$0xff]  ;;  %v240_v51 = vld [vmem:[#allocation7 + $0x80] sm:$0xff] }
  0x23   :  { %145 = vmatpush.msra.mxu1 %v110_v18  ;;  %258 = vmatpush.msra.mxu3 %v250_v38  ;;  %v159_v52 = vld [vmem:[%s636_s2 + $0x8] sm:$0xff]  ;;  %v238_v54 = vld [vmem:[#allocation7 + $0x70] sm:$0xff]  ;;  %v245_v55 = vld [vmem:[#allocation7 + $0xa8] sm:$0xff] }
  0x24   :  { %126 = vmatpush.msra.mxu0 %v93_v20  ;;  %v247_v53 = vld [vmem:[#allocation7 + $0xb8] sm:$0xff]  ;;  %v236_v56 = vld [vmem:[#allocation7 + $0x60] sm:$0xff]  ;;  %v234_v58 = vld [vmem:[#allocation7 + $0x50] sm:$0xff] }
  0x25   :  { %146 = vmatpush.msra.mxu1 %v109_v21  ;;  %259 = vmatpush.msra.mxu3 %v248_v41  ;;  %v243_v57 = vld [vmem:[#allocation7 + $0x98] sm:$0xff]  ;;  %v241_v59 = vld [vmem:[#allocation7 + $0x88] sm:$0xff]  ;;  %v232_v60 = vld [vmem:[#allocation7 + $0x40] sm:$0xff] }
  0x26   :  { %127 = vmatpush.msra.mxu0 %v92_v22  ;;  %v160_v61 = vld [vmem:[%s636_s2 + $0x10] sm:$0xff]  ;;  %v239_v62 = vld [vmem:[#allocation7 + $0x78] sm:$0xff]  ;;  %v237_v63 = vld [vmem:[#allocation7 + $0x68] sm:$0xff] }
  0x27   :  { %147 = vmatpush.msra.mxu1 %v108_v23  ;;  %260 = vmatpush.msra.mxu3 %v246_v45  ;;  %v235_v0 = vld [vmem:[#allocation7 + $0x58] sm:$0xff]  ;;  %v233_v1 = vld [vmem:[#allocation7 + $0x48] sm:$0xff]  ;;  %v230_v4 = vld [vmem:[#allocation7 + $0x30] sm:$0xff] }
  0x28   :  { %128 = vmatpush.msra.mxu0 %v91_v24  ;;  %v161_v2 = vld [vmem:[%s636_s2 + $0x18] sm:$0xff]  ;;  %v231_v3 = vld [vmem:[#allocation7 + $0x38] sm:$0xff]  ;;  %v228_v6 = vld [vmem:[#allocation7 + $0x20] sm:$0xff] }
  0x29   :  { %148 = vmatpush.msra.mxu1 %v107_v25  ;;  %261 = vmatpush.msra.mxu3 %v244_v47  ;;  %v229_v5 = vld [vmem:[#allocation7 + $0x28] sm:$0xff]  ;;  %v227_v7 = vld [vmem:[#allocation7 + $0x18] sm:$0xff]  ;;  %v226_v8 = vld [vmem:[#allocation7 + $0x10] sm:$0xff] }
  0x2a   :  { %129 = vmatpush.msra.mxu0 %v90_v26  ;;  %v225_v9 = vld [vmem:[#allocation7 + $0x8] sm:$0xff]  ;;  %v224_v10 = vld [vmem:[#allocation7] sm:$0xff]  ;;  %v204_v11 = vld [vmem:[%s637_s3] sm:$0xff] }
  0x2b   :  { %149 = vmatpush.msra.mxu1 %v106_v27  ;;  %262 = vmatpush.msra.mxu3 %v242_v49  ;;  %v212_v13 = vld [vmem:[#allocation6] sm:$0xff]  ;;  %v205_v17 = vld [vmem:[%s637_s3 + $0x8] sm:$0xff]  ;;  %v213_v19 = vld [vmem:[#allocation6 + $0x8] sm:$0xff] }
  0x2c   :  { %130 = vmatpush.msra.mxu0 %v89_v28  ;;  %v206_v23 = vld [vmem:[%s637_s3 + $0x10] sm:$0xff]  ;;  %v214_v25 = vld [vmem:[#allocation6 + $0x10] sm:$0xff] }
  0x2d   :  { %150 = vmatpush.msra.mxu1 %v105_v29  ;;  %263 = vmatpush.msra.mxu3 %v240_v51  ;;  %v207_v29 = vld [vmem:[%s637_s3 + $0x18] sm:$0xff] }
  0x2e   :  { %131 = vmatpush.msra.mxu0 %v88_v30 }
  0x2f   :  { %151 = vmatpush.msra.mxu1 %v104_v31  ;;  %264 = vmatpush.msra.mxu3 %v238_v54  ;;  %v215_v31 = vld [vmem:[#allocation6 + $0x18] sm:$0xff] }
  0x30   :  { %132 = vmatpush.msra.mxu0 %v87_v32 }
  0x31   :  { %152 = vmatpush.msra.mxu1 %v103_v33  ;;  %265 = vmatpush.msra.mxu3 %v236_v56 }
  0x32   :  { %133 = vmatpush.msra.mxu0 %v86_v34 }
  0x33   :  { %153 = vmatpush.msra.mxu1 %v102_v35  ;;  %134 = vmatmul.f32.vlgmr.msra.gmra.mxu0 %v84_v14 }
  0x34   :  { %154 = vmatmul.f32.vlgmr.msra.gmra.mxu1 %v85_v16  ;;  %266 = vmatpush.msra.mxu3 %v234_v58 }
  0x36   :  { %267 = vmatpush.msra.mxu3 %v232_v60 }
  0x38   :  { %268 = vmatpush.msra.mxu3 %v230_v4 }
  0x3a   :  { %269 = vmatpush.msra.mxu3 %v228_v6 }
  0x3c   :  { %270 = vmatpush.msra.mxu3 %v226_v8 }
  0x3e   :  { %271 = vmatpush.msra.mxu3 %v224_v10 }
  0xb0   :  { %v135_v39 = vpop.f32.mrf.mxu0 }
  0xb1   :  { %v155_v40 = vpop.f32.mrf.mxu1 }
  0xb2   :  { %v156_v42 = vadd.f32 %v155_v40, %v135_v39 }
  0xb4   :  { %190 = vmatpush.msra.mxu2 %v156_v42 }
  0xb5   :  { %377 = vmatmul.msk.f32.vlgmr.msra.gmra.mxu2 %vm162_vm0, %v158_v43 }
  0xb6   :  { %285 = vmatpush.msrb.mxu2 %v255_v44 }
  0xb8   :  { %286 = vmatpush.msrb.mxu2 %v253_v46 }
  0xba   :  { %287 = vmatpush.msrb.mxu2 %v251_v48 }
  0xbc   :  { %288 = vmatpush.msrb.mxu2 %v249_v50 }
  0xbd   :  { %378 = vmatmul.msk.f32.gmra.mxu2 %vm162_vm0, %v159_v52 }
  0xbe   :  { %289 = vmatpush.msrb.mxu2 %v247_v53 }
  0xc0   :  { %290 = vmatpush.msrb.mxu2 %v245_v55 }
  0xc2   :  { %291 = vmatpush.msrb.mxu2 %v243_v57 }
  0xc4   :  { %292 = vmatpush.msrb.mxu2 %v241_v59 }
  0xc5   :  { %379 = vmatmul.msk.f32.gmra.mxu2 %vm162_vm0, %v160_v61 }
  0xc6   :  { %293 = vmatpush.msrb.mxu2 %v239_v62 }
  0xc8   :  { %294 = vmatpush.msrb.mxu2 %v237_v63 }
  0xca   :  { %295 = vmatpush.msrb.mxu2 %v235_v0 }
  0xcc   :  { %296 = vmatpush.msrb.mxu2 %v233_v1 }
  0xcd   :  { %380 = vmatmul.msk.f32.gmra.mxu2 %vm162_vm0, %v161_v2 }
  0xce   :  { %297 = vmatpush.msrb.mxu2 %v231_v3 }
  0xd0   :  { %298 = vmatpush.msrb.mxu2 %v229_v5 }
  0xd2   :  { %299 = vmatpush.msrb.mxu2 %v227_v7 }
  0xd4   :  { %300 = vmatpush.msrb.mxu2 %v225_v9 }
 0x138   :  { %v192_v12 = vpop.f32.mrf.mxu2 }
 0x139   :  { %v208_v14 = vmul.f32 %v204_v11, %v192_v12 }
 0x13b   :  { %v216_v15 = vadd.f32 %v212_v13, %v208_v14 }
 0x13d   :  { %v220_v16 = vmax.f32 %v216_v15, 0.0 }
 0x13f   :  { %272 = vmatmul.f32.vlgmr.msra.gmra.mxu3 %v220_v16  ;;  %301 = vmatmul.f32.vlgmr.msrb.gmra.mxu2 %v220_v16 }
 0x140   :  { %v195_v18 = vpop.f32.mrf.mxu2 }
 0x141   :  { %v209_v20 = vmul.f32 %v205_v17, %v195_v18 }
 0x143   :  { %v217_v21 = vadd.f32 %v213_v19, %v209_v20 }
 0x145   :  { %v221_v22 = vmax.f32 %v217_v21, 0.0 }
 0x147   :  { %275 = vmatmul.f32.gmra.mxu3 %v221_v22  ;;  %304 = vmatmul.f32.gmra.mxu2 %v221_v22 }
 0x148   :  { %v198_v24 = vpop.f32.mrf.mxu2 }
 0x149   :  { %v210_v26 = vmul.f32 %v206_v23, %v198_v24 }
 0x14b   :  { %v218_v27 = vadd.f32 %v214_v25, %v210_v26 }
 0x14d   :  { %v222_v28 = vmax.f32 %v218_v27, 0.0 }
 0x14f   :  { %278 = vmatmul.f32.gmra.mxu3 %v222_v28  ;;  %307 = vmatmul.f32.gmra.mxu2 %v222_v28 }
 0x150   :  { %v201_v30 = vpop.f32.mrf.mxu2 }
 0x151   :  { %v211_v32 = vmul.f32 %v207_v29, %v201_v30 }
 0x153   :  { %v219_v33 = vadd.f32 %v215_v31, %v211_v32 }
 0x155   :  { %v223_v34 = vmax.f32 %v219_v33, 0.0 }
 0x157   :  { %281 = vmatmul.f32.gmra.mxu3 %v223_v34  ;;  %310 = vmatmul.f32.gmra.mxu2 %v223_v34 }
 0x1c2   :  { %v273_v35 = vpop.f32.mrf.mxu3  ;;  %v302_v36 = vpop.f32.mrf.mxu2 }
 0x1c3   :  { %v321_v37 = vrot.slane %v273_v35, 4  ;;  %v322_v38 = vrot.slane %v302_v36, 4 }
 0x1c5   :  { %333 = vst [vmem:[%s640_s6] sm:$0xf0] %v321_v37 }
 0x1c6   :  { %334 = vst [vmem:[%s640_s6 + $0x8] sm:$0xf0] %v322_v38 }
 0x1ca   :  { %v276_v39 = vpop.f32.mrf.mxu3  ;;  %v305_v40 = vpop.f32.mrf.mxu2 }
 0x1cb   :  { %v323_v41 = vrot.slane %v276_v39, 4  ;;  %v325_v42 = vrot.slane %v305_v40, 4 }
 0x1cd   :  { %v324_v43 = vsel %vm320_vm1, %v321_v37, %v323_v41  ;;  %337 = vst [vmem:[%s640_s6 + $0x20] sm:$0xf] %v323_v41  ;;  %v326_v44 = vsel %vm320_vm1, %v322_v38, %v325_v42 }
 0x1ce   :  { %335 = vst [vmem:[%s640_s6 + $0x10] sm:$0xff] %v324_v43 }
 0x1cf   :  { %336 = vst [vmem:[%s640_s6 + $0x18] sm:$0xff] %v326_v44 }
 0x1d0   :  { %338 = vst [vmem:[%s640_s6 + $0x28] sm:$0xf] %v325_v42 }
 0x1d2   :  { %v279_v45 = vpop.f32.mrf.mxu3  ;;  %v308_v46 = vpop.f32.mrf.mxu2 }
 0x1d3   :  { %v352_v47 = vrot.slane %v279_v45, 4  ;;  %v353_v48 = vrot.slane %v308_v46, 4 }
 0x1d5   :  { %383 = vst [vmem:[%s640_s6 + $0x30] sm:$0xf0] %v352_v47 }
 0x1d6   :  { %384 = vst [vmem:[%s640_s6 + $0x38] sm:$0xf0] %v353_v48 }
 0x1da   :  { %v282_v49 = vpop.f32.mrf.mxu3  ;;  %v311_v50 = vpop.f32.mrf.mxu2 }
 0x1db   :  { %v354_v51 = vrot.slane %v282_v49, 4  ;;  %v356_v52 = vrot.slane %v311_v50, 4 }
 0x1dd   :  { %v355_v53 = vsel %vm320_vm1, %v352_v47, %v354_v51  ;;  %387 = vst [vmem:[%s640_s6 + $0x50] sm:$0xf] %v354_v51  ;;  %v357_v54 = vsel %vm320_vm1, %v353_v48, %v356_v52 }
 0x1de   :  { %385 = vst [vmem:[%s640_s6 + $0x40] sm:$0xff] %v355_v53 }
 0x1df   :  { %386 = vst [vmem:[%s640_s6 + $0x48] sm:$0xff] %v357_v54 }
 0x1e0   :  { %388 = vst [vmem:[%s640_s6 + $0x58] sm:$0xf] %v356_v52 }
 0x1e1   :  { %374 = vsyncpa [#allocation3], 1 }
 0x1e2   :  { %375 = vsyncpa [#allocation5], 1 }
 0x1e3   :  { %376 = vsyncpa [#allocation8], 1 }

</bundles_post_ra>
